<compile_context>
chip_gen: v5e
topology: v5e:2x2
jax: 0.10.0
libtpu: 0.0.40
codegen_flags: <defaults>
</compile_context>

<pallas_src>
import jax
import jax.numpy as jnp
from jax.experimental import pallas as pl
from jax.experimental.pallas import tpu as pltpu

HIDDEN = 300        # matches nn.Linear(s_dim, 300) / nn.Linear(300, 300)
LANE = 128
SUBLANE = 8
HIDDEN_PAD = 384    # 300 rounded up to a multiple of 128 (lane-dense)


def _round_up(x, m):
    return ((x + m - 1) // m) * m


def _actor_kernel(ab_ref, s_ref, w1_ref, b1_ref, w2_ref, b2_ref,
                  wmu_ref, bmu_ref, out_ref):
    # bf16 operands on the MXU, f32 accumulation; bias/ReLU/tanh stay in f32.
    x = s_ref[...].astype(jnp.bfloat16)                                 # (TB, s_dim)
    h1 = jnp.dot(x, w1_ref[...], preferred_element_type=jnp.float32)    # (TB, 384)
    h1 = jnp.maximum(h1 + b1_ref[...], 0.0).astype(jnp.bfloat16)
    h2 = jnp.dot(h1, w2_ref[...], preferred_element_type=jnp.float32)   # (TB, 384)
    h2 = jnp.maximum(h2 + b2_ref[...], 0.0).astype(jnp.bfloat16)
    mu = jnp.dot(h2, wmu_ref[...], preferred_element_type=jnp.float32)  # (TB, a_pad)
    mu = jnp.tanh(mu + bmu_ref[...]) * ab_ref[0, 0]
    # Only the first a_dim columns are real; store just those (tiny writeback).
    a_dim = out_ref.shape[1]
    out_ref[...] = mu[:, :a_dim].astype(out_ref.dtype)


def init_actor_params(key, s_dim, a_dim):
    """PyTorch nn.Linear-style init (uniform +/- 1/sqrt(fan_in)); weights
    stored transposed vs. PyTorch, i.e. (in_features, out_features)."""
    ks = jax.random.split(key, 6)

    def lin(kw, kb, fan_in, fan_out):
        bound = 1.0 / jnp.sqrt(jnp.float32(fan_in))
        w = jax.random.uniform(kw, (fan_in, fan_out), jnp.float32, -bound, bound)
        b = jax.random.uniform(kb, (fan_out,), jnp.float32, -bound, bound)
        return w, b

    w1, b1 = lin(ks[0], ks[1], s_dim, HIDDEN)
    w2, b2 = lin(ks[2], ks[3], HIDDEN, HIDDEN)
    wmu, bmu = lin(ks[4], ks[5], HIDDEN, a_dim)
    return {"w1": w1, "b1": b1, "w2": w2, "b2": b2, "wmu": wmu, "bmu": bmu}


def pack_actor_params(params):
    """One-time packing: zero-pad feature dims to multiples of 128, cast
    weights to bf16, reshape biases to (1, F) rows (kept in f32)."""
    s_dim = params["w1"].shape[0]
    a_dim = params["wmu"].shape[1]
    a_pad = _round_up(a_dim, LANE)

    def pad_w(w, rows, cols):
        out = jnp.zeros((rows, cols), jnp.float32)
        out = out.at[: w.shape[0], : w.shape[1]].set(w)
        return out.astype(jnp.bfloat16)

    def pad_b(b, cols):
        out = jnp.zeros((1, cols), jnp.float32)
        return out.at[0, : b.shape[0]].set(b)

    return {
        "w1": pad_w(params["w1"], s_dim, HIDDEN_PAD),
        "b1": pad_b(params["b1"], HIDDEN_PAD),
        "w2": pad_w(params["w2"], HIDDEN_PAD, HIDDEN_PAD),
        "b2": pad_b(params["b2"], HIDDEN_PAD),
        "wmu": pad_w(params["wmu"], HIDDEN_PAD, a_pad),
        "bmu": pad_b(params["bmu"], a_pad),
        "a_dim": int(a_dim),
    }


def actor_forward(s, packed, a_bound):
    """s: (B, s_dim) float32. packed: output of pack_actor_params.
    Returns (B, a_dim) float32."""
    B, s_dim = s.shape
    a_dim = packed["a_dim"]

    # Batch tile: multiple of 8 sublanes.  Cap at 1024 rows to amortize the
    # ~0.35 us per-grid-step overhead; for B >= 64 force at least 2 grid
    # steps so both v7x TensorCores get work (no-op on single-TC v5e/v6e).
    TB_CAP = 1024
    if B >= 64:
        tb = min(TB_CAP, _round_up(pl.cdiv(B, 2), SUBLANE))
    else:
        tb = max(SUBLANE, min(TB_CAP, _round_up(B, SUBLANE)))
    grid = (pl.cdiv(B, tb),)

    ab = jnp.asarray(a_bound, jnp.float32).reshape(1, 1)

    def resident(shape):
        # Constant index_map -> block stays VMEM-resident across grid steps.
        return pl.BlockSpec(shape, lambda i: (0, 0))

    out = pl.pallas_call(
        _actor_kernel,
        out_shape=jax.ShapeDtypeStruct((B, a_dim), jnp.float32),
        grid=grid,
        in_specs=[
            pl.BlockSpec((1, 1), lambda i: (0, 0),
                         memory_space=pltpu.MemorySpace.SMEM),  # a_bound scalar
            pl.BlockSpec((tb, s_dim), lambda i: (i, 0)),        # state tile (K unpadded)
            resident(packed["w1"].shape),
            resident(packed["b1"].shape),
            resident(packed["w2"].shape),
            resident(packed["b2"].shape),
            resident(packed["wmu"].shape),
            resident(packed["bmu"].shape),
        ],
        # Last dim a_dim equals the full array dim -> legal block; writeback
        # is only tb*a_dim*4 bytes per step instead of tb*128*4.
        out_specs=pl.BlockSpec((tb, a_dim), lambda i: (i, 0)),
        compiler_params=pltpu.CompilerParams(
            dimension_semantics=("parallel",),
            # Headroom for f32/bf16 intermediates at tb=1024 on v5e's 16 MiB
            # default scoped VMEM; well inside v7x's 64 MiB physical per TC.
            vmem_limit_bytes=32 * 1024 * 1024),
    )(ab, s, packed["w1"], packed["b1"], packed["w2"], packed["b2"],
      packed["wmu"], packed["bmu"])

    return out


if __name__ == "__main__":
    key = jax.random.PRNGKey(0)
    k_param, k_state, k_state2 = jax.random.split(key, 3)

    s_dim, a_dim = 16, 4
    a_bound = 2.0  # corresponds to a_bound[1] in the PyTorch module

    params = init_actor_params(k_param, s_dim, a_dim)
    packed = pack_actor_params(params)

    # Reference #1: same bf16-operand / f32-accumulate math in pure JAX.
    def ref_bf16(x):
        h1 = jnp.dot(x.astype(jnp.bfloat16), params["w1"].astype(jnp.bfloat16),
                     preferred_element_type=jnp.float32)
        h1 = jnp.maximum(h1 + params["b1"], 0.0)
        h2 = jnp.dot(h1.astype(jnp.bfloat16), params["w2"].astype(jnp.bfloat16),
                     preferred_element_type=jnp.float32)
        h2 = jnp.maximum(h2 + params["b2"], 0.0)
        m = jnp.dot(h2.astype(jnp.bfloat16), params["wmu"].astype(jnp.bfloat16),
                    preferred_element_type=jnp.float32)
        return jnp.tanh(m + params["bmu"]) * a_bound

    # Reference #2: full-precision (PyTorch-equivalent) math.  The ~5e-2
    # tolerance vs. f32 is the intentional bf16-MXU precision trade.
    def ref_f32(x):
        h1 = jnp.maximum(x @ params["w1"] + params["b1"], 0.0)
        h2 = jnp.maximum(h1 @ params["w2"] + params["b2"], 0.0)
        return jnp.tanh(h2 @ params["wmu"] + params["bmu"]) * a_bound

    # Small-batch case (single grid step).
    batch = 8
    s = jax.random.normal(k_state, (batch, s_dim), jnp.float32)
    mu = jax.block_until_ready(actor_forward(s, packed, a_bound))
    assert mu.shape == (batch, a_dim)
    assert jnp.allclose(mu, ref_bf16(s), atol=5e-3, rtol=5e-3)
    assert jnp.allclose(mu, ref_f32(s), atol=5e-2, rtol=5e-2)

    # Larger batch: exercises the 2-step grid split (v7x core sharding) and a
    # partial final tile (B not a multiple of tb) — OOB rows are padded on
    # read and their output writes discarded by Pallas.
    batch2 = 100
    s2 = jax.random.normal(k_state2, (batch2, s_dim), jnp.float32)
    mu2 = jax.block_until_ready(actor_forward(s2, packed, a_bound))
    assert mu2.shape == (batch2, a_dim)
    assert jnp.allclose(mu2, ref_bf16(s2), atol=5e-3, rtol=5e-3)
    assert jnp.allclose(mu2, ref_f32(s2), atol=5e-2, rtol=5e-2)

    print("KERNEL_OK")
</pallas_src>

<mosaic_0001>
module attributes {stable_mosaic.version = 11 : i64} {
  func.func @_actor_kernel(%arg0: i32, %arg1: memref<1x1xf32, #tpu.memory_space<smem>>, %arg2: memref<8x16xf32, #tpu.memory_space<vmem>>, %arg3: memref<16x384xbf16, #tpu.memory_space<vmem>>, %arg4: memref<1x384xf32, #tpu.memory_space<vmem>>, %arg5: memref<384x384xbf16, #tpu.memory_space<vmem>>, %arg6: memref<1x384xf32, #tpu.memory_space<vmem>>, %arg7: memref<384x128xbf16, #tpu.memory_space<vmem>>, %arg8: memref<1x128xf32, #tpu.memory_space<vmem>>, %arg9: memref<8x4xf32, #tpu.memory_space<vmem>>) attributes {dimension_semantics = [#tpu.dimension_semantics<parallel>], iteration_bounds = array<i64: 1>, scalar_prefetch = 0 : i64, scratch_operands = 0 : i64, tpu.core_type = #tpu.core_type<tc>, window_params = [{transform_indices = @transform_0, window_bounds = array<i64: 1, 1>}, {transform_indices = @transform_1, window_bounds = array<i64: 8, 16>}, {pipeline_mode = #tpu.pipeline_mode<synchronous>, transform_indices = @transform_2, window_bounds = array<i64: 16, 384>}, {pipeline_mode = #tpu.pipeline_mode<synchronous>, transform_indices = @transform_3, window_bounds = array<i64: 1, 384>}, {pipeline_mode = #tpu.pipeline_mode<synchronous>, transform_indices = @transform_4, window_bounds = array<i64: 384, 384>}, {pipeline_mode = #tpu.pipeline_mode<synchronous>, transform_indices = @transform_5, window_bounds = array<i64: 1, 384>}, {pipeline_mode = #tpu.pipeline_mode<synchronous>, transform_indices = @transform_6, window_bounds = array<i64: 384, 128>}, {pipeline_mode = #tpu.pipeline_mode<synchronous>, transform_indices = @transform_7, window_bounds = array<i64: 1, 128>}, {transform_indices = @transform_8, window_bounds = array<i64: 8, 4>}]} {
    %c0 = arith.constant 0 : index
    %c0_0 = arith.constant 0 : index
    %0 = vector.load %arg2[%c0, %c0_0] : memref<8x16xf32, #tpu.memory_space<vmem>>, vector<8x16xf32>
    %1 = arith.truncf %0 : vector<8x16xf32> to vector<8x16xbf16>
    %c0_1 = arith.constant 0 : index
    %c0_2 = arith.constant 0 : index
    %2 = vector.load %arg3[%c0_1, %c0_2] : memref<16x384xbf16, #tpu.memory_space<vmem>>, vector<16x384xbf16>
    %cst = arith.constant dense<0.000000e+00> : vector<8x384xf32>
    %3 = tpu.matmul %1, %2, %cst {dimension_numbers = #tpu.dot_dimension_numbers<[1], [0], [0], [1], [0, 0, 1, 1], [], []>} : vector<8x16xbf16>, vector<16x384xbf16>, vector<8x384xf32> -> vector<8x384xf32>
    %c0_3 = arith.constant 0 : index
    %c0_4 = arith.constant 0 : index
    %4 = vector.load %arg4[%c0_3, %c0_4] : memref<1x384xf32, #tpu.memory_space<vmem>>, vector<1x384xf32>
    %5 = vector.broadcast %4 : vector<1x384xf32> to vector<8x384xf32>
    %6 = arith.addf %3, %5 : vector<8x384xf32>
    %cst_5 = arith.constant 0.000000e+00 : f32
    %7 = vector.broadcast %cst_5 : f32 to vector<8x384xf32>
    %8 = arith.maximumf %6, %7 : vector<8x384xf32>
    %9 = arith.truncf %8 : vector<8x384xf32> to vector<8x384xbf16>
    %c0_6 = arith.constant 0 : index
    %c0_7 = arith.constant 0 : index
    %10 = vector.load %arg5[%c0_6, %c0_7] : memref<384x384xbf16, #tpu.memory_space<vmem>>, vector<384x384xbf16>
    %cst_8 = arith.constant dense<0.000000e+00> : vector<8x384xf32>
    %11 = tpu.matmul %9, %10, %cst_8 {dimension_numbers = #tpu.dot_dimension_numbers<[1], [0], [0], [1], [0, 0, 1, 1], [], []>} : vector<8x384xbf16>, vector<384x384xbf16>, vector<8x384xf32> -> vector<8x384xf32>
    %c0_9 = arith.constant 0 : index
    %c0_10 = arith.constant 0 : index
    %12 = vector.load %arg6[%c0_9, %c0_10] : memref<1x384xf32, #tpu.memory_space<vmem>>, vector<1x384xf32>
    %13 = vector.broadcast %12 : vector<1x384xf32> to vector<8x384xf32>
    %14 = arith.addf %11, %13 : vector<8x384xf32>
    %cst_11 = arith.constant 0.000000e+00 : f32
    %15 = vector.broadcast %cst_11 : f32 to vector<8x384xf32>
    %16 = arith.maximumf %14, %15 : vector<8x384xf32>
    %17 = arith.truncf %16 : vector<8x384xf32> to vector<8x384xbf16>
    %c0_12 = arith.constant 0 : index
    %c0_13 = arith.constant 0 : index
    %18 = vector.load %arg7[%c0_12, %c0_13] : memref<384x128xbf16, #tpu.memory_space<vmem>>, vector<384x128xbf16>
    %cst_14 = arith.constant dense<0.000000e+00> : vector<8x128xf32>
    %19 = tpu.matmul %17, %18, %cst_14 {dimension_numbers = #tpu.dot_dimension_numbers<[1], [0], [0], [1], [0, 0, 1, 1], [], []>} : vector<8x384xbf16>, vector<384x128xbf16>, vector<8x128xf32> -> vector<8x128xf32>
    %c0_15 = arith.constant 0 : index
    %c0_16 = arith.constant 0 : index
    %20 = vector.load %arg8[%c0_15, %c0_16] : memref<1x128xf32, #tpu.memory_space<vmem>>, vector<1x128xf32>
    %21 = vector.broadcast %20 : vector<1x128xf32> to vector<8x128xf32>
    %22 = arith.addf %19, %21 : vector<8x128xf32>
    %23 = math.tanh %22 : vector<8x128xf32>
    %c0_17 = arith.constant 0 : index
    %c0_18 = arith.constant 0 : index
    %24 = memref.load %arg1[%c0_17, %c0_18] : memref<1x1xf32, #tpu.memory_space<smem>>
    %25 = vector.broadcast %24 : f32 to vector<8x128xf32>
    %26 = arith.mulf %23, %25 : vector<8x128xf32>
    %27 = vector.extract_strided_slice %26 {offsets = [0, 0], sizes = [8, 4], strides = [1, 1]} : vector<8x128xf32> to vector<8x4xf32>
    %c0_19 = arith.constant 0 : index
    %c0_20 = arith.constant 0 : index
    %28 = vector.load %arg9[%c0_19, %c0_20] : memref<8x4xf32, #tpu.memory_space<vmem>>, vector<8x4xf32>
    tpu.vector_store %arg9[%c0_19, %c0_20], %27 {strides = array<i32>} : memref<8x4xf32, #tpu.memory_space<vmem>>, vector<8x4xf32>,
    return
  }
  func.func @transform_0(%arg0: i32) -> (i32, i32) {
    %c0_i32 = arith.constant 0 : i32
    %c0_i32_0 = arith.constant 0 : i32
    %c0_i32_1 = arith.constant 0 : i32
    return %c0_i32, %c0_i32_0 : i32, i32
  }
  func.func @transform_1(%arg0: i32) -> (i32, i32) {
    %c0_i32 = arith.constant 0 : i32
    %c0_i32_0 = arith.constant 0 : i32
    return %arg0, %c0_i32 : i32, i32
  }
  func.func @transform_2(%arg0: i32) -> (i32, i32) {
    %c0_i32 = arith.constant 0 : i32
    %c0_i32_0 = arith.constant 0 : i32
    %c0_i32_1 = arith.constant 0 : i32
    return %c0_i32, %c0_i32_0 : i32, i32
  }
  func.func @transform_3(%arg0: i32) -> (i32, i32) {
    %c0_i32 = arith.constant 0 : i32
    %c0_i32_0 = arith.constant 0 : i32
    %c0_i32_1 = arith.constant 0 : i32
    return %c0_i32, %c0_i32_0 : i32, i32
  }
  func.func @transform_4(%arg0: i32) -> (i32, i32) {
    %c0_i32 = arith.constant 0 : i32
    %c0_i32_0 = arith.constant 0 : i32
    %c0_i32_1 = arith.constant 0 : i32
    return %c0_i32, %c0_i32_0 : i32, i32
  }
  func.func @transform_5(%arg0: i32) -> (i32, i32) {
    %c0_i32 = arith.constant 0 : i32
    %c0_i32_0 = arith.constant 0 : i32
    %c0_i32_1 = arith.constant 0 : i32
    return %c0_i32, %c0_i32_0 : i32, i32
  }
  func.func @transform_6(%arg0: i32) -> (i32, i32) {
    %c0_i32 = arith.constant 0 : i32
    %c0_i32_0 = arith.constant 0 : i32
    %c0_i32_1 = arith.constant 0 : i32
    return %c0_i32, %c0_i32_0 : i32, i32
  }
  func.func @transform_7(%arg0: i32) -> (i32, i32) {
    %c0_i32 = arith.constant 0 : i32
    %c0_i32_0 = arith.constant 0 : i32
    %c0_i32_1 = arith.constant 0 : i32
    return %c0_i32, %c0_i32_0 : i32, i32
  }
  func.func @transform_8(%arg0: i32) -> (i32, i32) {
    %c0_i32 = arith.constant 0 : i32
    %c0_i32_0 = arith.constant 0 : i32
    return %arg0, %c0_i32 : i32, i32
  }
}

</mosaic_0001>

<bundles_post_ra>
// kernel: tpu_custom_call.1
= control target key start
LH: loop header
LB: loop body
LE: loop exit
PB: predicated region body
PF: predicated region fallthrough
CT: control target
= control target key end

     0   :  { %14 = vsyncpa [#allocation4], 0  ;;  %s1763_s0 = inlined_call_operand.<no memory space> [shape: f32[1,1], index: 0, kind: input, shape index: {}]   ;;  %s1764_s1 = inlined_call_operand.hbm [shape: f32[8,16], index: 1, kind: input, shape index: {}]   ;;  %s1765_s2 = inlined_call_operand.hbm [shape: bf16[16,384], index: 2, kind: input, shape index: {}]   ;;  %s1766_s3 = inlined_call_operand.vmem [shape: f32[1,384], index: 3, kind: input, shape index: {}]   ;;  %s1767_s4 = inlined_call_operand.hbm [shape: bf16[384,384], index: 4, kind: input, shape index: {}]   ;;  %s1768_s5 = inlined_call_operand.hbm [shape: f32[1,384], index: 5, kind: input, shape index: {}]   ;;  %s1769_s6 = inlined_call_operand.hbm [shape: bf16[384,128], index: 6, kind: input, shape index: {}]   ;;  %s1770_s7 = inlined_call_operand.vmem [shape: f32[1,128], index: 7, kind: input, shape index: {}]   ;;  %s1771_s8 = inlined_call_operand.vmem [shape: f32[8,4], index: 8, kind: output, shape index: {}]  }
   0x1   :  { %15 = vsyncpa [#allocation6], 0  ;;  %s34_s29 = sshll.u32 %s1765_s2, 4  ;;  %s35_s29 = int_to_ptr.hbm [resolvable:$true] %s34_s29 }
   0x2   :  { %16 = vsyncpa [#allocation9], 0  ;;  %s1679_s30 = smov [#allocation5]   ;;  %s63_s12 = sshll.u32 %s1768_s5, 4  ;;  %s64_s12 = int_to_ptr.hbm [resolvable:$true] %s63_s12 }
   0x3   :  { %s36_s9 = sshll.u32 %s1679_s30, 4  ;;  %s1680_s13 = smov 192   ;;  %s37_s9 = int_to_ptr.vmem [resolvable:$true] %s36_s9 }
   0x4   :  { %s1681_s14 = smov 12   ;;  %s1682_s15 = smov [#allocation8]  }
   0x5   :  { %42 = dma.hbm_to_vmem [thread:$0]  %s35_s29, 384, %s37_s9, [#allocation6], %s1680_s13, %s1680_s13, %s1681_s14  }
   0x6   :  { %s65_s16 = sshll.u32 %s1682_s15, 4  ;;  %s24_s19 = sshll.u32 %s1764_s1, 4  ;;  %s66_s16 = int_to_ptr.vmem [resolvable:$true] %s65_s16  ;;  %s25_s19 = int_to_ptr.hbm [resolvable:$true] %s24_s19 }
   0x7   :  { %68 = dma.hbm_to_vmem [thread:$0]  %s64_s12, 48, %s66_s16, [#allocation9]  }
   0x8   :  { %s49_s21 = sshll.u32 %s1767_s4, 4  ;;  %s1683_s22 = smov [#allocation3]   ;;  %s50_s21 = int_to_ptr.hbm [resolvable:$true] %s49_s21 }
   0x9   :  { %s26_s23 = sshll.u32 %s1683_s22, 4  ;;  %s1684_s5 = smov [#allocation7]   ;;  %s27_s23 = int_to_ptr.vmem [resolvable:$true] %s26_s23 }
   0xa   :  { %29 = dma.hbm_to_vmem [thread:$0]  %s25_s19, 128, %s27_s23, [#allocation4]  }
   0xb   :  { %s51_s24 = sshll.u32 %s1684_s5, 4  ;;  %s73_s27 = sshll.u32 %s1769_s6, 4  ;;  %s52_s24 = int_to_ptr.vmem [resolvable:$true] %s51_s24  ;;  %s74_s27 = int_to_ptr.hbm [resolvable:$true] %s73_s27 }
   0xc   :  { %57 = dma.hbm_to_vmem [thread:$0]  %s50_s21, 9216, %s52_s24, [#allocation6], %s1680_s13, %s1680_s13, %s1681_s14  }
   0xd   :  { %s1685_s1 = smov [#allocation10]   ;;  %s1686_s29 = smov 64  }
   0xe   :  { %s75_s28 = sshll.u32 %s1685_s1, 4  ;;  %s1687_s30 = smov 4   ;;  %s76_s28 = int_to_ptr.vmem [resolvable:$true] %s75_s28 }
   0xf   :  { %81 = dma.hbm_to_vmem [thread:$0]  %s74_s27, 3072, %s76_s28, [#allocation9], %s1686_s29, %s1686_s29, %s1687_s30  }
  0x10   :  { %1673 = dma.done.wait [#allocation4], 128  }
  0x11   :  { %1674 = vsyncadd [#allocation4], 4294967168 }
  0x12   :  { %1675 = dma.done.wait [#allocation6], 9600  }
  0x13   :  { %1676 = vsyncadd [#allocation6], 4294957696 }
  0x14   :  { %1677 = dma.done.wait [#allocation9], 3120  }
  0x15   :  { %1678 = vsyncadd [#allocation9], 4294964176  ;;  %v1045_v0 = vld [vmem:[#allocation5] sm:$0xf]  ;;  %v1443_v1 = vld [vmem:[#allocation5 + $0x8] sm:$0xf0] }
  0x16   :  { %v1442_v2 = vld [vmem:[#allocation5 + $0x4] sm:$0xf]  ;;  %v1046_v3 = vor.u32 %v1443_v1, %v1045_v0  ;;  %v1047_v4 = vld [vmem:[#allocation5 + $0xc] sm:$0xf0]  ;;  %v1053_v5 = vld [vmem:[#allocation5 + $0x8] sm:$0xf] }
  0x17   :  { %v1444_v6 = vld [vmem:[#allocation5 + $0x10] sm:$0xf0]  ;;  %v1050_v7 = vor.u32 %v1442_v2, %v1047_v4  ;;  %v105_v9 = vld [vmem:[#allocation3] sm:$0xff]  ;;  %v1144_v10 = vld [vmem:[#allocation7 + $0xa8] sm:$0xf]  ;;  %vm135_vm0 = vcmask 130048  }
  0x18   :  { %v1054_v8 = vor.u32 %v1444_v6, %v1053_v5  ;;  %v1467_v11 = vld [vmem:[#allocation7 + $0xb0] sm:$0xf0]  ;;  %146 = vmatpush.bf16.msra.mxu0 %v1046_v3  ;;  %v106_v12 = vpack.c.bf16 %v105_v9, %v105_v9  ;;  %v1132_v14 = vld [vmem:[#allocation7 + $0x90] sm:$0xf]  ;;  %v1464_v15 = vld [vmem:[#allocation7 + $0x98] sm:$0xf0] }
  0x19   :  { %v1145_v13 = vor.u32 %v1467_v11, %v1144_v10  ;;  %159 = vmatpush.bf16.msra.mxu1 %v1050_v7  ;;  %v1133_v16 = vor.u32 %v1464_v15, %v1132_v14  ;;  %v1240_v17 = vld [vmem:[#allocation7 + $0x168] sm:$0xf]  ;;  %v1491_v18 = vld [vmem:[#allocation7 + $0x170] sm:$0xf0]  ;;  %v1466_v19 = vld [vmem:[#allocation7 + $0xac] sm:$0xf] }
  0x1a   :  { %172 = vmatpush.bf16.msra.mxu2 %v1054_v8  ;;  %v1120_v20 = vld [vmem:[#allocation7 + $0x78] sm:$0xf]  ;;  %v1461_v21 = vld [vmem:[#allocation7 + $0x80] sm:$0xf0]  ;;  %v1241_v22 = vor.u32 %v1491_v18, %v1240_v17  ;;  %v1228_v25 = vld [vmem:[#allocation7 + $0x150] sm:$0xf] }
  0x1b   :  { %672 = vmatpush.bf16.msra.mxu3 %v1145_v13  ;;  %1055 = vmatmul.msk.bf16.vlgmr.msra.gmra.mxu0 %vm135_vm0, %v106_v12  ;;  %v1146_v23 = vld [vmem:[#allocation7 + $0xb4] sm:$0xf0]  ;;  %v1488_v26 = vld [vmem:[#allocation7 + $0x158] sm:$0xf0]  ;;  %v1463_v27 = vld [vmem:[#allocation7 + $0x94] sm:$0xf]  ;;  %v1121_v32 = vor.u32 %v1461_v21, %v1120_v20 }
  0x1c   :  { %1056 = vmatmul.msk.bf16.vlgmr.msra.gmra.mxu1 %vm135_vm0, %v106_v12  ;;  %v1149_v24 = vor.u32 %v1466_v19, %v1146_v23  ;;  %685 = vmatpush.bf16.msrb.mxu0 %v1241_v22  ;;  %v1229_v28 = vor.u32 %v1488_v26, %v1228_v25  ;;  %v1134_v29 = vld [vmem:[#allocation7 + $0x9c] sm:$0xf0]  ;;  %v1336_v30 = vld [vmem:[#allocation7 + $0x228] sm:$0xf]  ;;  %v1515_v31 = vld [vmem:[#allocation7 + $0x230] sm:$0xf0] }
  0x1d   :  { %1057 = vmatmul.msk.bf16.vlgmr.msra.gmra.mxu2 %vm135_vm0, %v106_v12  ;;  %v1108_v33 = vld [vmem:[#allocation7 + $0x60] sm:$0xf]  ;;  %v1458_v34 = vld [vmem:[#allocation7 + $0x68] sm:$0xf0]  ;;  %v1137_v35 = vor.u32 %v1463_v27, %v1134_v29  ;;  %v1337_v36 = vor.u32 %v1515_v31, %v1336_v30  ;;  %v1216_v37 = vld [vmem:[#allocation7 + $0x138] sm:$0xf] }
  0x1e   :  { %711 = vmatpush.bf16.msrb.mxu2 %v1149_v24  ;;  %v1485_v38 = vld [vmem:[#allocation7 + $0x140] sm:$0xf0]  ;;  %v1460_v39 = vld [vmem:[#allocation7 + $0x7c] sm:$0xf]  ;;  %v1122_v40 = vld [vmem:[#allocation7 + $0x84] sm:$0xf0]  ;;  %v1109_v47 = vor.u32 %v1458_v34, %v1108_v33 }
  0x1f   :  { %673 = vmatpush.bf16.msra.mxu3 %v1133_v16  ;;  %698 = vmatpush.bf16.msrb.mxu1 %v1337_v36  ;;  %v1324_v41 = vld [vmem:[#allocation7 + $0x210] sm:$0xf]  ;;  %v1512_v42 = vld [vmem:[#allocation7 + $0x218] sm:$0xf0]  ;;  %v1096_v43 = vld [vmem:[#allocation7 + $0x48] sm:$0xf]  ;;  %v1217_v45 = vor.u32 %v1485_v38, %v1216_v37  ;;  %v1125_v48 = vor.u32 %v1460_v39, %v1122_v40 }
  0x20   :  { %v1455_v44 = vld [vmem:[#allocation7 + $0x50] sm:$0xf0]  ;;  %686 = vmatpush.bf16.msrb.mxu0 %v1229_v28  ;;  %v1325_v46 = vor.u32 %v1512_v42, %v1324_v41  ;;  %v1204_v49 = vld [vmem:[#allocation7 + $0x120] sm:$0xf]  ;;  %v1482_v50 = vld [vmem:[#allocation7 + $0x128] sm:$0xf0] }
  0x21   :  { %v1312_v51 = vld [vmem:[#allocation7 + $0x1f8] sm:$0xf]  ;;  %v1457_v52 = vld [vmem:[#allocation7 + $0x64] sm:$0xf]  ;;  %v1110_v53 = vld [vmem:[#allocation7 + $0x6c] sm:$0xf0]  ;;  %v1205_v57 = vor.u32 %v1482_v50, %v1204_v49  ;;  %v1097_v59 = vor.u32 %v1455_v44, %v1096_v43 }
  0x22   :  { %712 = vmatpush.bf16.msrb.mxu2 %v1137_v35  ;;  %v1509_v54 = vld [vmem:[#allocation7 + $0x200] sm:$0xf0]  ;;  %v1084_v56 = vld [vmem:[#allocation7 + $0x30] sm:$0xf]  ;;  %v1192_v58 = vld [vmem:[#allocation7 + $0x108] sm:$0xf]  ;;  %v1113_v60 = vor.u32 %v1457_v52, %v1110_v53 }
  0x23   :  { %674 = vmatpush.bf16.msra.mxu3 %v1121_v32  ;;  %699 = vmatpush.bf16.msrb.mxu1 %v1325_v46  ;;  %v1313_v55 = vor.u32 %v1509_v54, %v1312_v51  ;;  %v1479_v61 = vld [vmem:[#allocation7 + $0x110] sm:$0xf0]  ;;  %v1300_v62 = vld [vmem:[#allocation7 + $0x1e0] sm:$0xf]  ;;  %v1506_v63 = vld [vmem:[#allocation7 + $0x1e8] sm:$0xf0] }
  0x24   :  { %687 = vmatpush.bf16.msrb.mxu0 %v1217_v45  ;;  %v1452_v0 = vld [vmem:[#allocation7 + $0x38] sm:$0xf0]  ;;  %v1454_v1 = vld [vmem:[#allocation7 + $0x4c] sm:$0xf]  ;;  %v1098_v2 = vld [vmem:[#allocation7 + $0x54] sm:$0xf0]  ;;  %v1301_v3 = vor.u32 %v1506_v63, %v1300_v62  ;;  %v1193_v4 = vor.u32 %v1479_v61, %v1192_v58 }
  0x25   :  { %v1288_v5 = vld [vmem:[#allocation7 + $0x1c8] sm:$0xf]  ;;  %v1503_v6 = vld [vmem:[#allocation7 + $0x1d0] sm:$0xf0]  ;;  %v1085_v7 = vor.u32 %v1452_v0, %v1084_v56  ;;  %v1072_v8 = vld [vmem:[#allocation7 + $0x18] sm:$0xf]  ;;  %v1101_v9 = vor.u32 %v1454_v1, %v1098_v2 }
  0x26   :  { %713 = vmatpush.bf16.msrb.mxu2 %v1125_v48  ;;  %v1180_v10 = vld [vmem:[#allocation7 + $0xf0] sm:$0xf]  ;;  %v1476_v11 = vld [vmem:[#allocation7 + $0xf8] sm:$0xf0]  ;;  %v1449_v12 = vld [vmem:[#allocation7 + $0x20] sm:$0xf0]  ;;  %v1289_v15 = vor.u32 %v1503_v6, %v1288_v5 }
  0x27   :  { %675 = vmatpush.bf16.msra.mxu3 %v1109_v47  ;;  %700 = vmatpush.bf16.msrb.mxu1 %v1313_v55  ;;  %v1451_v13 = vld [vmem:[#allocation7 + $0x34] sm:$0xf]  ;;  %v1086_v14 = vld [vmem:[#allocation7 + $0x3c] sm:$0xf0]  ;;  %v1181_v16 = vor.u32 %v1476_v11, %v1180_v10  ;;  %v1276_v17 = vld [vmem:[#allocation7 + $0x1b0] sm:$0xf]  ;;  %v1073_v19 = vor.u32 %v1449_v12, %v1072_v8 }
  0x28   :  { %688 = vmatpush.bf16.msrb.mxu0 %v1205_v57  ;;  %v1500_v18 = vld [vmem:[#allocation7 + $0x1b8] sm:$0xf0]  ;;  %v1060_v20 = vld [vmem:[#allocation7] sm:$0xf]  ;;  %v1089_v21 = vor.u32 %v1451_v13, %v1086_v14  ;;  %v1168_v22 = vld [vmem:[#allocation7 + $0xd8] sm:$0xf] }
  0x29   :  { %v1473_v23 = vld [vmem:[#allocation7 + $0xe0] sm:$0xf0]  ;;  %v1446_v24 = vld [vmem:[#allocation7 + $0x8] sm:$0xf0]  ;;  %v1448_v25 = vld [vmem:[#allocation7 + $0x1c] sm:$0xf]  ;;  %v1277_v29 = vor.u32 %v1500_v18, %v1276_v17 }
  0x2a   :  { %714 = vmatpush.bf16.msrb.mxu2 %v1113_v60  ;;  %v1074_v26 = vld [vmem:[#allocation7 + $0x24] sm:$0xf0]  ;;  %v1490_v27 = vld [vmem:[#allocation7 + $0x16c] sm:$0xf]  ;;  %v1242_v28 = vld [vmem:[#allocation7 + $0x174] sm:$0xf0]  ;;  %v1169_v30 = vor.u32 %v1473_v23, %v1168_v22  ;;  %v1061_v33 = vor.u32 %v1446_v24, %v1060_v20 }
  0x2b   :  { %676 = vmatpush.bf16.msra.mxu3 %v1097_v59  ;;  %701 = vmatpush.bf16.msrb.mxu1 %v1301_v3  ;;  %v1264_v31 = vld [vmem:[#allocation7 + $0x198] sm:$0xf]  ;;  %v1497_v32 = vld [vmem:[#allocation7 + $0x1a0] sm:$0xf0]  ;;  %v1487_v34 = vld [vmem:[#allocation7 + $0x154] sm:$0xf]  ;;  %v1077_v36 = vor.u32 %v1448_v25, %v1074_v26  ;;  %v1245_v40 = vor.u32 %v1490_v27, %v1242_v28 }
  0x2c   :  { %689 = vmatpush.bf16.msrb.mxu0 %v1193_v4  ;;  %v1230_v35 = vld [vmem:[#allocation7 + $0x15c] sm:$0xf0]  ;;  %v1470_v38 = vld [vmem:[#allocation7 + $0xc8] sm:$0xf0]  ;;  %v1445_v39 = vld [vmem:[#allocation7 + $0x4] sm:$0xf]  ;;  %v1265_v46 = vor.u32 %v1497_v32, %v1264_v31 }
  0x2d   :  { %v1156_v37 = vld [vmem:[#allocation7 + $0xc0] sm:$0xf]  ;;  %v1062_v41 = vld [vmem:[#allocation7 + $0xc] sm:$0xf0]  ;;  %v1514_v42 = vld [vmem:[#allocation7 + $0x22c] sm:$0xf]  ;;  %v1233_v54 = vor.u32 %v1487_v34, %v1230_v35 }
  0x2e   :  { %715 = vmatpush.bf16.msrb.mxu2 %v1101_v9  ;;  %v1338_v43 = vld [vmem:[#allocation7 + $0x234] sm:$0xf0]  ;;  %v1248_v44 = vld [vmem:[#allocation7 + $0x170] sm:$0xf]  ;;  %v1492_v45 = vld [vmem:[#allocation7 + $0x178] sm:$0xf0]  ;;  %v1157_v47 = vor.u32 %v1470_v38, %v1156_v37  ;;  %v1065_v50 = vor.u32 %v1445_v39, %v1062_v41 }
  0x2f   :  { %677 = vmatpush.bf16.msra.mxu3 %v1085_v7  ;;  %702 = vmatpush.bf16.msrb.mxu1 %v1289_v15  ;;  %v1252_v48 = vld [vmem:[#allocation7 + $0x180] sm:$0xf]  ;;  %v1494_v49 = vld [vmem:[#allocation7 + $0x188] sm:$0xf0]  ;;  %v1341_v51 = vor.u32 %v1514_v42, %v1338_v43  ;;  %v1152_v52 = vld [vmem:[#allocation7 + $0xb0] sm:$0xf]  ;;  %v1249_v56 = vor.u32 %v1492_v45, %v1248_v44 }
  0x30   :  { %690 = vmatpush.bf16.msrb.mxu0 %v1181_v16  ;;  %v1468_v53 = vld [vmem:[#allocation7 + $0xb8] sm:$0xf0]  ;;  %v1511_v57 = vld [vmem:[#allocation7 + $0x214] sm:$0xf]  ;;  %v1326_v58 = vld [vmem:[#allocation7 + $0x21c] sm:$0xf0]  ;;  %v1253_v62 = vor.u32 %v1494_v49, %v1252_v48 }
  0x31   :  { %v1484_v55 = vld [vmem:[#allocation7 + $0x13c] sm:$0xf]  ;;  %v1218_v59 = vld [vmem:[#allocation7 + $0x144] sm:$0xf0]  ;;  %v1236_v60 = vld [vmem:[#allocation7 + $0x158] sm:$0xf]  ;;  %v1153_v63 = vor.u32 %v1468_v53, %v1152_v52  ;;  %v1329_v0 = vor.u32 %v1511_v57, %v1326_v58 }
  0x32   :  { %716 = vmatpush.bf16.msrb.mxu2 %v1089_v21  ;;  %v1489_v61 = vld [vmem:[#allocation7 + $0x160] sm:$0xf0]  ;;  %v1221_v1 = vor.u32 %v1484_v55, %v1218_v59  ;;  %v1206_v4 = vld [vmem:[#allocation7 + $0x12c] sm:$0xf0]  ;;  %v1478_v6 = vld [vmem:[#allocation7 + $0x10c] sm:$0xf] }
  0x33   :  { %678 = vmatpush.bf16.msra.mxu3 %v1073_v19  ;;  %703 = vmatpush.bf16.msrb.mxu1 %v1277_v29  ;;  %v1237_v2 = vor.u32 %v1489_v61, %v1236_v60  ;;  %v1481_v3 = vld [vmem:[#allocation7 + $0x124] sm:$0xf]  ;;  %v1194_v7 = vld [vmem:[#allocation7 + $0x114] sm:$0xf0]  ;;  %v1475_v9 = vld [vmem:[#allocation7 + $0xf4] sm:$0xf] }
  0x34   :  { %691 = vmatpush.bf16.msrb.mxu0 %v1169_v30  ;;  %v1209_v5 = vor.u32 %v1481_v3, %v1206_v4  ;;  %v1197_v8 = vor.u32 %v1478_v6, %v1194_v7  ;;  %v1182_v10 = vld [vmem:[#allocation7 + $0xfc] sm:$0xf0]  ;;  %v1508_v12 = vld [vmem:[#allocation7 + $0x1fc] sm:$0xf]  ;;  %v1314_v13 = vld [vmem:[#allocation7 + $0x204] sm:$0xf0] }
  0x35   :  { %v1185_v11 = vor.u32 %v1475_v9, %v1182_v10  ;;  %v1224_v14 = vld [vmem:[#allocation7 + $0x140] sm:$0xf]  ;;  %v1317_v15 = vor.u32 %v1508_v12, %v1314_v13  ;;  %v1486_v16 = vld [vmem:[#allocation7 + $0x148] sm:$0xf0]  ;;  %v1140_v18 = vld [vmem:[#allocation7 + $0x98] sm:$0xf] }
  0x36   :  { %717 = vmatpush.bf16.msrb.mxu2 %v1077_v36  ;;  %v1225_v17 = vor.u32 %v1486_v16, %v1224_v14  ;;  %v1465_v19 = vld [vmem:[#allocation7 + $0xa0] sm:$0xf0]  ;;  %v1472_v21 = vld [vmem:[#allocation7 + $0xdc] sm:$0xf]  ;;  %v1170_v22 = vld [vmem:[#allocation7 + $0xe4] sm:$0xf0] }
  0x37   :  { %679 = vmatpush.bf16.msra.mxu3 %v1061_v33  ;;  %704 = vmatpush.bf16.msrb.mxu1 %v1265_v46  ;;  %v1141_v20 = vor.u32 %v1465_v19, %v1140_v18  ;;  %v1173_v23 = vor.u32 %v1472_v21, %v1170_v22  ;;  %v1505_v24 = vld [vmem:[#allocation7 + $0x1e4] sm:$0xf]  ;;  %v1302_v25 = vld [vmem:[#allocation7 + $0x1ec] sm:$0xf0]  ;;  %v1212_v26 = vld [vmem:[#allocation7 + $0x128] sm:$0xf] }
  0x38   :  { %692 = vmatpush.bf16.msrb.mxu0 %v1157_v47  ;;  %v1305_v27 = vor.u32 %v1505_v24, %v1302_v25  ;;  %v1483_v28 = vld [vmem:[#allocation7 + $0x130] sm:$0xf0]  ;;  %v1128_v30 = vld [vmem:[#allocation7 + $0x80] sm:$0xf]  ;;  %v1462_v31 = vld [vmem:[#allocation7 + $0x88] sm:$0xf0] }
  0x39   :  { %v1213_v29 = vor.u32 %v1483_v28, %v1212_v26  ;;  %v1129_v32 = vor.u32 %v1462_v31, %v1128_v30  ;;  %v1469_v33 = vld [vmem:[#allocation7 + $0xc4] sm:$0xf]  ;;  %v1158_v34 = vld [vmem:[#allocation7 + $0xcc] sm:$0xf0]  ;;  %v1502_v36 = vld [vmem:[#allocation7 + $0x1cc] sm:$0xf] }
  0x3a   :  { %718 = vmatpush.bf16.msrb.mxu2 %v1065_v50  ;;  %v1161_v35 = vor.u32 %v1469_v33, %v1158_v34  ;;  %v1290_v37 = vld [vmem:[#allocation7 + $0x1d4] sm:$0xf0]  ;;  %v1200_v39 = vld [vmem:[#allocation7 + $0x110] sm:$0xf]  ;;  %v1116_v42 = vld [vmem:[#allocation7 + $0x68] sm:$0xf] }
  0x3b   :  { %724 = vmatpush.bf16.msrb.mxu3 %v1245_v40  ;;  %705 = vmatpush.bf16.msrb.mxu1 %v1253_v62  ;;  %v1293_v38 = vor.u32 %v1502_v36, %v1290_v37  ;;  %v1480_v40 = vld [vmem:[#allocation7 + $0x118] sm:$0xf0]  ;;  %v1459_v43 = vld [vmem:[#allocation7 + $0x70] sm:$0xf0]  ;;  %v1278_v46 = vld [vmem:[#allocation7 + $0x1bc] sm:$0xf0] }
  0x3c   :  { %737 = vmatpush.bf16.msra.mxu0 %v1341_v51  ;;  %v1201_v41 = vor.u32 %v1480_v40, %v1200_v39  ;;  %v1117_v44 = vor.u32 %v1459_v43, %v1116_v42  ;;  %v1499_v45 = vld [vmem:[#allocation7 + $0x1b4] sm:$0xf]  ;;  %v1188_v47 = vld [vmem:[#allocation7 + $0xf8] sm:$0xf]  ;;  %v1477_v49 = vld [vmem:[#allocation7 + $0x100] sm:$0xf0] }
  0x3d   :  { %v1281_v48 = vor.u32 %v1499_v45, %v1278_v46  ;;  %v1189_v50 = vor.u32 %v1477_v49, %v1188_v47  ;;  %v1104_v51 = vld [vmem:[#allocation7 + $0x50] sm:$0xf]  ;;  %v1456_v52 = vld [vmem:[#allocation7 + $0x58] sm:$0xf0]  ;;  %v1266_v55 = vld [vmem:[#allocation7 + $0x1a4] sm:$0xf0] }
  0x3e   :  { %763 = vmatpush.bf16.msra.mxu2 %v1249_v56  ;;  %v1105_v53 = vor.u32 %v1456_v52, %v1104_v51  ;;  %v1176_v56 = vld [vmem:[#allocation7 + $0xe0] sm:$0xf]  ;;  %v1474_v58 = vld [vmem:[#allocation7 + $0xe8] sm:$0xf0]  ;;  %v1092_v60 = vld [vmem:[#allocation7 + $0x38] sm:$0xf] }
  0x3f   :  { %725 = vmatpush.bf16.msrb.mxu3 %v1233_v54  ;;  %750 = vmatpush.bf16.msra.mxu1 %v1153_v63  ;;  %v1496_v54 = vld [vmem:[#allocation7 + $0x19c] sm:$0xf]  ;;  %v1177_v59 = vor.u32 %v1474_v58, %v1176_v56  ;;  %v1453_v61 = vld [vmem:[#allocation7 + $0x40] sm:$0xf0]  ;;  %v1450_v6 = vld [vmem:[#allocation7 + $0x28] sm:$0xf0] }
  0x40   :  { %738 = vmatpush.bf16.msra.mxu0 %v1329_v0  ;;  %v1269_v57 = vor.u32 %v1496_v54, %v1266_v55  ;;  %v1493_v62 = vld [vmem:[#allocation7 + $0x184] sm:$0xf]  ;;  %v1093_v63 = vor.u32 %v1453_v61, %v1092_v60  ;;  %v1254_v0 = vld [vmem:[#allocation7 + $0x18c] sm:$0xf0]  ;;  %v1447_v9 = vld [vmem:[#allocation7 + $0x10] sm:$0xf0] }
  0x41   :  { %v1257_v3 = vor.u32 %v1493_v62, %v1254_v0  ;;  %v1516_v18 = vld [vmem:[#allocation7 + $0x238] sm:$0xf0]  ;;  %v1332_v25 = vld [vmem:[#allocation7 + $0x218] sm:$0xf]  ;;  %v1513_v26 = vld [vmem:[#allocation7 + $0x220] sm:$0xf0] }
  0x42   :  { %764 = vmatpush.bf16.msra.mxu2 %v1237_v2  ;;  %v1471_v2 = vld [vmem:[#allocation7 + $0xd0] sm:$0xf0]  ;;  %v1320_v34 = vld [vmem:[#allocation7 + $0x200] sm:$0xf]  ;;  %v1308_v40 = vld [vmem:[#allocation7 + $0x1e8] sm:$0xf] }
  0x43   :  { %726 = vmatpush.bf16.msrb.mxu3 %v1221_v1  ;;  %751 = vmatpush.bf16.msra.mxu1 %v1141_v20  ;;  %v1164_v1 = vld [vmem:[#allocation7 + $0xc8] sm:$0xf]  ;;  %v1523_v36 = vld [vmem:[#allocation10 + $0x30] sm:$0xff]  ;;  %v1522_v42 = vld [vmem:[#allocation10 + $0x28] sm:$0xff]  ;;  %vm1034_vm1 = vcmask 31744  }
  0x44   :  { %739 = vmatpush.bf16.msra.mxu0 %v1317_v15  ;;  %v1165_v4 = vor.u32 %v1471_v2, %v1164_v1  ;;  %v1296_v45 = vld [vmem:[#allocation7 + $0x1d0] sm:$0xf]  ;;  %v1504_v46 = vld [vmem:[#allocation7 + $0x1d8] sm:$0xf0]  ;;  %v1521_v47 = vld [vmem:[#allocation10 + $0x20] sm:$0xff] }
  0x45   :  { %v1284_v49 = vld [vmem:[#allocation7 + $0x1b8] sm:$0xf]  ;;  %v1272_v52 = vld [vmem:[#allocation7 + $0x1a0] sm:$0xf]  ;;  %v1260_v55 = vld [vmem:[#allocation7 + $0x188] sm:$0xf] }
  0x46   :  { %765 = vmatpush.bf16.msra.mxu2 %v1225_v17  ;;  %v1344_v17 = vld [vmem:[#allocation7 + $0x230] sm:$0xf]  ;;  %v1495_v56 = vld [vmem:[#allocation7 + $0x190] sm:$0xf0]  ;;  %v1532_v58 = vld [vmem:[#allocation10 + $0x78] sm:$0xff] }
  0x47   :  { %727 = vmatpush.bf16.msrb.mxu3 %v1209_v5  ;;  %752 = vmatpush.bf16.msra.mxu1 %v1129_v32  ;;  %v1080_v5 = vld [vmem:[#allocation7 + $0x20] sm:$0xf]  ;;  %v1333_v32 = vor.u32 %v1513_v26, %v1332_v25  ;;  %v1531_v60 = vld [vmem:[#allocation10 + $0x70] sm:$0xff]  ;;  %v1530_v62 = vld [vmem:[#allocation10 + $0x68] sm:$0xff] }
  0x48   :  { %740 = vmatpush.bf16.msra.mxu0 %v1305_v27  ;;  %v1081_v7 = vor.u32 %v1450_v6, %v1080_v5  ;;  %v1519_v61 = vld [vmem:[#allocation10 + $0x10] sm:$0xff]  ;;  %v1529_v0 = vld [vmem:[#allocation10 + $0x60] sm:$0xff]  ;;  %v1540_v2 = vld [vmem:[#allocation10 + $0xb8] sm:$0xff] }
  0x49   :  { %v1517_v1 = vld [vmem:[#allocation10] sm:$0xff]  ;;  %v1527_v5 = vld [vmem:[#allocation10 + $0x50] sm:$0xff]  ;;  %v1538_v6 = vld [vmem:[#allocation10 + $0xa8] sm:$0xff] }
  0x4a   :  { %766 = vmatpush.bf16.msra.mxu2 %v1213_v29  ;;  %v1524_v29 = vld [vmem:[#allocation10 + $0x38] sm:$0xff] }
  0x4b   :  { %728 = vmatpush.bf16.msrb.mxu3 %v1197_v8  ;;  %753 = vmatpush.bf16.msra.mxu1 %v1117_v44  ;;  %v1068_v8 = vld [vmem:[#allocation7 + $0x8] sm:$0xf] }
  0x4c   :  { %741 = vmatpush.bf16.msra.mxu0 %v1293_v38  ;;  %v1069_v10 = vor.u32 %v1447_v9, %v1068_v8  ;;  %v1537_v8 = vld [vmem:[#allocation10 + $0xa0] sm:$0xff] }
  0x4d   :  { %v1525_v9 = vld [vmem:[#allocation10 + $0x40] sm:$0xff] }
  0x4e   :  { %767 = vmatpush.bf16.msra.mxu2 %v1201_v41  ;;  %v1507_v41 = vld [vmem:[#allocation7 + $0x1f0] sm:$0xf0] }
  0x4f   :  { %729 = vmatpush.bf16.msrb.mxu3 %v1185_v11  ;;  %754 = vmatpush.bf16.msra.mxu1 %v1105_v53  ;;  %v111_v11 = vld [vmem:[%s1766_s3] sm:$0x7]  ;;  %v1309_v44 = vor.u32 %v1507_v41, %v1308_v40  ;;  %v1498_v53 = vld [vmem:[#allocation7 + $0x1a8] sm:$0xf0] }
  0x50   :  { %742 = vmatpush.bf16.msra.mxu0 %v1281_v48  ;;  %v113_v12 = vperm.slane %v111_v11, 0  ;;  %v114_v13 = vperm.slane %v111_v11, 1  ;;  %v115_v22 = vperm.slane %v111_v11, 2  ;;  %v1297_v48 = vor.u32 %v1504_v46, %v1296_v45  ;;  %v1535_v11 = vld [vmem:[#allocation10 + $0x90] sm:$0xff] }
  0x51   :  { %v1273_v54 = vor.u32 %v1498_v53, %v1272_v52 }
  0x52   :  { %768 = vmatpush.bf16.msra.mxu2 %v1189_v50  ;;  %v1501_v50 = vld [vmem:[#allocation7 + $0x1c0] sm:$0xf0] }
  0x53   :  { %730 = vmatpush.bf16.msrb.mxu3 %v1173_v23  ;;  %755 = vmatpush.bf16.msra.mxu1 %v1093_v63  ;;  %v1345_v23 = vor.u32 %v1516_v18, %v1344_v17  ;;  %v1285_v51 = vor.u32 %v1501_v50, %v1284_v49  ;;  %v1518_v63 = vld [vmem:[#allocation10 + $0x8] sm:$0xff] }
  0x54   :  { %743 = vmatpush.bf16.msra.mxu0 %v1269_v57  ;;  %v1261_v57 = vor.u32 %v1495_v56, %v1260_v55  ;;  %v1550_v55 = vld [vmem:[%s1770_s7] ss:$0 sm:$0xff] }
  0x56   :  { %769 = vmatpush.bf16.msra.mxu2 %v1177_v59  ;;  %v1520_v59 = vld [vmem:[#allocation10 + $0x18] sm:$0xff] }
  0x57   :  { %731 = vmatpush.bf16.msrb.mxu3 %v1161_v35  ;;  %756 = vmatpush.bf16.msra.mxu1 %v1081_v7  ;;  %v1510_v35 = vld [vmem:[#allocation7 + $0x208] sm:$0xf0] }
  0x58   :  { %744 = vmatpush.bf16.msra.mxu0 %v1257_v3  ;;  %v1321_v39 = vor.u32 %v1510_v35, %v1320_v34  ;;  %v1528_v3 = vld [vmem:[#allocation10 + $0x58] sm:$0xff]  ;;  %v1526_v7 = vld [vmem:[#allocation10 + $0x48] sm:$0xff] }
  0x5a   :  { %770 = vmatpush.bf16.msra.mxu2 %v1165_v4  ;;  %v1539_v4 = vld [vmem:[#allocation10 + $0xb0] sm:$0xff] }
  0x5b   :  { %757 = vmatpush.bf16.msra.mxu1 %v1069_v10  ;;  %v1536_v10 = vld [vmem:[#allocation10 + $0x98] sm:$0xff] }
  0x98   :  { %v148_v14 = vpop.f32.mrf.mxu0 }
  0x99   :  { %v149_v15 = vadd.f32 %v148_v14, %v113_v12  ;;  %v161_v16 = vpop.f32.mrf.mxu1  ;;  %v280_v12 = vld [vmem:[#allocation8] sm:$0x7] }
  0x9a   :  { %v162_v19 = vadd.f32 %v161_v16, %v114_v13  ;;  %v282_v14 = vperm.slane %v280_v12, 0  ;;  %v284_v40 = vperm.slane %v280_v12, 2 }
  0x9b   :  { %v178_v20 = vmax.f32 %v149_v15, 0.0  ;;  %v1534_v15 = vld [vmem:[#allocation10 + $0x88] sm:$0xff] }
  0x9c   :  { %v179_v21 = vmax.f32 %v162_v19, 0.0 }
  0x9d   :  { %v181_v24 = vpack.c.bf16 %v178_v20, %v178_v20 }
  0x9e   :  { %v182_v27 = vpack.c.bf16 %v179_v21, %v179_v21 }
  0x9f   :  { %680 = vmatmul.bf16.vlgmr.msra.gmra.mxu3 %v181_v24  ;;  %719 = vmatmul.bf16.vlgmr.msrb.gmra.mxu2 %v181_v24 }
  0xa0   :  { %v174_v28 = vpop.f32.mrf.mxu2  ;;  %693 = vmatmul.bf16.vlgmr.msrb.gmra.mxu0 %v182_v27  ;;  %v150_v31 = vpop.f32.mrf.mxu0  ;;  %776 = vmatpush.bf16.msra.mxu3 %v1345_v23 }
  0xa1   :  { %v175_v30 = vadd.f32 %v174_v28, %v115_v22  ;;  %v163_v33 = vpop.f32.mrf.mxu1  ;;  %991 = vmatpush.bf16.msrb.mxu0 %v1524_v29  ;;  %1017 = vmatpush.bf16.msrb.mxu2 %v1540_v2  ;;  %v1533_v22 = vld [vmem:[#allocation10 + $0x80] sm:$0xff]  ;;  %v283_v29 = vperm.slane %v280_v12, 1 }
  0xa3   :  { %v180_v37 = vmax.f32 %v175_v30, 0.0 }
  0xa4   :  { %777 = vmatpush.bf16.msra.mxu3 %v1333_v32 }
  0xa5   :  { %v183_v38 = vpack.c.bf16 %v180_v37, %v180_v37  ;;  %992 = vmatpush.bf16.msrb.mxu0 %v1523_v36  ;;  %1018 = vmatpush.bf16.msrb.mxu2 %v1539_v4 }
  0xa7   :  { %706 = vmatmul.bf16.vlgmr.msrb.gmra.mxu1 %v183_v38 }
  0xa8   :  { %v176_v43 = vpop.f32.mrf.mxu2  ;;  %778 = vmatpush.bf16.msra.mxu3 %v1321_v39  ;;  %1004 = vmatpush.bf16.msrb.mxu1 %v1532_v58 }
  0xa9   :  { %993 = vmatpush.bf16.msrb.mxu0 %v1522_v42  ;;  %1019 = vmatpush.bf16.msrb.mxu2 %v1538_v6 }
  0xac   :  { %779 = vmatpush.bf16.msra.mxu3 %v1309_v44  ;;  %1005 = vmatpush.bf16.msrb.mxu1 %v1531_v60  ;;  %v1032_v60 = vstv %s1763_s0 }
  0xad   :  { %994 = vmatpush.bf16.msrb.mxu0 %v1521_v47  ;;  %1020 = vmatpush.bf16.msrb.mxu2 %v1537_v8 }
  0xaf   :  { %732 = vmatmul.bf16.vlgmr.msrb.gmra.mxu3 %v182_v27  ;;  %771 = vmatmul.bf16.vlgmr.msra.gmra.mxu2 %v182_v27 }
  0xb0   :  { %745 = vmatmul.bf16.vlgmr.msra.gmra.mxu0 %v183_v38  ;;  %780 = vmatpush.bf16.msra.mxu3 %v1297_v48 }
  0xb1   :  { %995 = vmatpush.bf16.msrb.mxu0 %v1520_v59  ;;  %1006 = vmatpush.bf16.msrb.mxu1 %v1530_v62 }
  0xb2   :  { %1021 = vmatpush.bf16.msrb.mxu2 %v1536_v10 }
  0xb4   :  { %781 = vmatpush.bf16.msra.mxu3 %v1285_v51 }
  0xb5   :  { %996 = vmatpush.bf16.msrb.mxu0 %v1519_v61  ;;  %1007 = vmatpush.bf16.msrb.mxu1 %v1529_v0 }
  0xb6   :  { %1022 = vmatpush.bf16.msrb.mxu2 %v1535_v11 }
  0xb7   :  { %758 = vmatmul.bf16.vlgmr.msra.gmra.mxu1 %v181_v24 }
  0xb8   :  { %782 = vmatpush.bf16.msra.mxu3 %v1273_v54 }
  0xb9   :  { %997 = vmatpush.bf16.msrb.mxu0 %v1518_v63  ;;  %1008 = vmatpush.bf16.msrb.mxu1 %v1528_v3 }
  0xba   :  { %1023 = vmatpush.bf16.msrb.mxu2 %v1534_v15 }
  0xbc   :  { %783 = vmatpush.bf16.msra.mxu3 %v1261_v57 }
  0xbd   :  { %998 = vmatpush.bf16.msrb.mxu0 %v1517_v1  ;;  %1009 = vmatpush.bf16.msrb.mxu1 %v1527_v5 }
  0xbe   :  { %1024 = vmatpush.bf16.msrb.mxu2 %v1533_v22 }
  0xbf   :  { %784 = vmatmul.bf16.vlgmr.msra.gmra.mxu3 %v183_v38 }
  0xc1   :  { %1010 = vmatpush.bf16.msrb.mxu1 %v1526_v7 }
  0xc5   :  { %1011 = vmatpush.bf16.msrb.mxu1 %v1525_v9 }
 0x11d   :  { %v694_v13 = vpop.f32.mrf.mxu0 }
 0x122   :  { %v681_v16 = vpop.f32.mrf.mxu3  ;;  %v720_v17 = vpop.f32.mrf.mxu2 }
 0x123   :  { %v682_v18 = vadd.f32 %v681_v16, %v282_v14  ;;  %v721_v31 = vadd.f32 %v720_v17, %v283_v29 }
 0x124   :  { %v707_v19 = vpop.f32.mrf.mxu1 }
 0x125   :  { %v695_v20 = vadd.f32 %v694_v13, %v682_v18  ;;  %v696_v21 = vpop.f32.mrf.mxu0 }
 0x127   :  { %v708_v23 = vadd.f32 %v707_v19, %v695_v20 }
 0x129   :  { %v789_v24 = vmax.f32 %v708_v23, 0.0 }
 0x12a   :  { %v683_v25 = vpop.f32.mrf.mxu3  ;;  %v722_v26 = vpop.f32.mrf.mxu2 }
 0x12b   :  { %v792_v27 = vpack.c.bf16 %v789_v24, %v789_v24 }
 0x12c   :  { %v709_v28 = vpop.f32.mrf.mxu1 }
 0x12d   :  { %v746_v30 = vpop.f32.mrf.mxu0  ;;  %999 = vmatmul.bf16.vlgmr.msrb.gmra.mxu0 %v792_v27 }
 0x132   :  { %v733_v32 = vpop.f32.mrf.mxu3  ;;  %v772_v33 = vpop.f32.mrf.mxu2 }
 0x133   :  { %v734_v34 = vadd.f32 %v733_v32, %v721_v31 }
 0x134   :  { %v759_v35 = vpop.f32.mrf.mxu1 }
 0x135   :  { %v747_v36 = vadd.f32 %v746_v30, %v734_v34  ;;  %v748_v37 = vpop.f32.mrf.mxu0  ;;  %v760_v44 = vadd.f32 %v759_v35, %v284_v40 }
 0x137   :  { %v790_v38 = vmax.f32 %v747_v36, 0.0  ;;  %v773_v45 = vadd.f32 %v772_v33, %v760_v44 }
 0x139   :  { %v793_v39 = vpack.c.bf16 %v790_v38, %v790_v38 }
 0x13a   :  { %v735_v41 = vpop.f32.mrf.mxu3  ;;  %v774_v42 = vpop.f32.mrf.mxu2 }
 0x13b   :  { %1012 = vmatmul.bf16.vlgmr.msrb.gmra.mxu1 %v793_v39 }
 0x13c   :  { %v761_v43 = vpop.f32.mrf.mxu1 }
 0x142   :  { %v785_v46 = vpop.f32.mrf.mxu3 }
 0x143   :  { %v786_v47 = vadd.f32 %v785_v46, %v773_v45 }
 0x145   :  { %v791_v48 = vmax.f32 %v786_v47, 0.0 }
 0x147   :  { %v794_v49 = vpack.c.bf16 %v791_v48, %v791_v48 }
 0x149   :  { %1025 = vmatmul.bf16.vlgmr.msrb.gmra.mxu2 %v794_v49 }
 0x14a   :  { %v787_v50 = vpop.f32.mrf.mxu3 }
 0x1aa   :  { %v1000_v51 = vpop.f32.mrf.mxu0 }
 0x1ab   :  { %v1001_v56 = vadd.f32 %v1550_v55, %v1000_v51 }
 0x1b2   :  { %v1002_v52 = vpop.f32.mrf.mxu0 }
 0x1b8   :  { %v1013_v53 = vpop.f32.mrf.mxu1 }
 0x1b9   :  { %v1014_v57 = vadd.f32 %v1013_v53, %v1001_v56 }
 0x1c0   :  { %v1015_v54 = vpop.f32.mrf.mxu1 }
 0x1cc   :  { %v1026_v58 = vpop.f32.mrf.mxu2 }
 0x1cd   :  { %v1027_v59 = vadd.f32 %v1026_v58, %v1014_v57 }
 0x1cf   :  { %1551 = vtanh.f32 %v1027_v59 }
 0x1d4   :  { %v1028_v61 = vpop.f32.mrf.mxu2 }
 0x1d5   :  { %v1552_v62 = vpop.eup %1551 }
 0x1d6   :  { %v1033_v63 = vmul.f32 %v1552_v62, %v1032_v60 }
 0x1d8   :  { %1035 = vst.msk [vmem:[%s1771_s8] sm:$0xff] %vm1034_vm1, %v1033_v63 }
 0x1d9   :  { %1040 = vsyncpa [#allocation4], 1 }
 0x1da   :  { %1041 = vsyncpa [#allocation6], 1 }
 0x1db   :  { %1042 = vsyncpa [#allocation9], 1 }

</bundles_post_ra>
